<compile_context>
chip_gen: v5e
topology: v5e:2x2
jax: 0.10.0
libtpu: 0.0.40
codegen_flags: <defaults>
</compile_context>

<pallas_src>
import jax
import jax.numpy as jnp
from jax.experimental import pallas as pl
from jax.experimental.pallas import tpu as pltpu


def _norm_kernel(img_ref, scale_ref, bias_ref, out_ref):
    # img_ref / out_ref  : (r_tile, hw_tile) lane-dense VMEM tiles
    # scale_ref / bias_ref: (r_tile, 1) f32 per-row params (broadcast over lanes)
    x = img_ref[...].astype(jnp.float32)
    out_ref[...] = (x * scale_ref[...] + bias_ref[...]).astype(out_ref.dtype)


def _pick_tile(extent: int, target: int, quantum: int) -> int:
    """Full extent when small; else the largest multiple of `quantum` <= target
    that evenly divides `extent`; else `target` (ragged tail fallback)."""
    if extent <= target:
        return extent
    top = (target // quantum) * quantum
    for cand in range(top, quantum - 1, -quantum):
        if extent % cand == 0:
            return cand
    return top


def normalization(img: jax.Array, mean: jax.Array, std: jax.Array,
                  *, r_tile_target: int = 256, hw_tile_target: int = 8192) -> jax.Array:
    """(img - mean[:,None,None]) / std[:,None,None]; img is NCHW."""
    N, C, H, W = img.shape
    assert mean.shape == (C,) and std.shape == (C,)
    R, HW = N * C, H * W

    # Output dtype: keep float inputs' dtype, promote integer inputs to f32.
    out_dtype = img.dtype if jnp.issubdtype(img.dtype, jnp.floating) else jnp.float32

    # Params stay in f32 and are folded: out = img * scale + bias.
    mean_f = mean.astype(jnp.float32)
    scale_f = 1.0 / std.astype(jnp.float32)          # 1/std
    bias_f = -mean_f * scale_f                       # -mean/std
    scale_rows = jnp.tile(scale_f, N)                # per-row (row = n*C + c)
    bias_rows = jnp.tile(bias_f, N)

    # Sublane folding for tiny N*C: view (R, HW) as (R*fold, HW/fold) so the
    # sublane dimension is >= 8; params are repeated `fold` times per row.
    fold = 1
    if R < 8 and HW > 1:
        k = -(-8 // R)                               # ceil(8 / R)
        while k <= HW and HW % k != 0:
            k += 1
        if k <= HW and HW % k == 0:
            fold = k
    Rf, HWf = R * fold, HW // fold

    # Free view: NCHW contiguous -> (R*fold, HW/fold) is a bitcast.
    # TODO(synk): if the producer hands over a non-contiguous layout, XLA will
    # materialize a copy here (perf cliff, not a correctness issue).
    img2 = img.reshape(Rf, HWf)
    scale2 = jnp.repeat(scale_rows, fold).reshape(Rf, 1)
    bias2 = jnp.repeat(bias_rows, fold).reshape(Rf, 1)

    # Tile selection: lane dim as largest 128-multiple dividing HWf, row dim as
    # largest 8-multiple dividing Rf (or full extent when small).
    r_tile = _pick_tile(Rf, r_tile_target, 8)
    hw_tile = _pick_tile(HWf, hw_tile_target, 128)

    # v7x has 2 TensorCores: if the grid would be a single step, split the
    # spatial axis in two when that still yields 128-aligned tiles.
    if pl.cdiv(Rf, r_tile) * pl.cdiv(HWf, hw_tile) == 1 and hw_tile % 256 == 0:
        hw_tile //= 2

    grid = (pl.cdiv(Rf, r_tile), pl.cdiv(HWf, hw_tile))

    in_bytes = R * HW * jnp.dtype(img.dtype).itemsize
    out_bytes = R * HW * jnp.dtype(out_dtype).itemsize
    cost = pl.CostEstimate(flops=2 * R * HW, transcendentals=0,
                           bytes_accessed=in_bytes + out_bytes + 2 * Rf * 4)

    out2 = pl.pallas_call(
        _norm_kernel,
        out_shape=jax.ShapeDtypeStruct((Rf, HWf), out_dtype),
        grid=grid,
        in_specs=[
            pl.BlockSpec((r_tile, hw_tile), lambda r, s: (r, s)),  # image tile
            pl.BlockSpec((r_tile, 1), lambda r, s: (r, 0)),        # scale column
            pl.BlockSpec((r_tile, 1), lambda r, s: (r, 0)),        # bias column
        ],
        out_specs=pl.BlockSpec((r_tile, hw_tile), lambda r, s: (r, s)),
        compiler_params=pltpu.CompilerParams(
            dimension_semantics=("parallel", "parallel"),
            vmem_limit_bytes=48 * 1024 * 1024,
        ),
        cost_estimate=cost,
    )(img2, scale2, bias2)

    return out2.reshape(N, C, H, W)


if __name__ == "__main__":
    key = jax.random.PRNGKey(0)

    N, C, H, W = 2, 3, 16, 16
    img = jax.random.uniform(key, (N, C, H, W), dtype=jnp.float32)

    # Classic ImageNet normalization constants (mirrors nn.Module __init__ args).
    mean = jnp.array([0.485, 0.456, 0.406], dtype=jnp.float32)
    std = jnp.array([0.229, 0.224, 0.225], dtype=jnp.float32)

    out = normalization(img, mean, std)
    out = jax.block_until_ready(out)

    # Reference (plain JAX, same broadcasting as PyTorch's (-1,1,1) view).
    ref = (img - mean[None, :, None, None]) / std[None, :, None, None]
    assert out.shape == img.shape and out.dtype == img.dtype
    assert jnp.allclose(out, ref, atol=1e-5, rtol=1e-5)

    print("KERNEL_OK")
</pallas_src>

<mosaic_0001>
module attributes {stable_mosaic.version = 11 : i64} {
  func.func @_norm_kernel(%arg0: i32, %arg1: i32, %arg2: memref<12x128xf32, #tpu.memory_space<vmem>>, %arg3: memref<12x1xf32, #tpu.memory_space<vmem>>, %arg4: memref<12x1xf32, #tpu.memory_space<vmem>>, %arg5: memref<12x128xf32, #tpu.memory_space<vmem>>) attributes {dimension_semantics = [#tpu.dimension_semantics<parallel>, #tpu.dimension_semantics<parallel>], iteration_bounds = array<i64: 1, 1>, scalar_prefetch = 0 : i64, scratch_operands = 0 : i64, tpu.core_type = #tpu.core_type<tc>, window_params = [{transform_indices = @transform_0, window_bounds = array<i64: 12, 128>}, {transform_indices = @transform_1, window_bounds = array<i64: 12, 1>}, {transform_indices = @transform_2, window_bounds = array<i64: 12, 1>}, {transform_indices = @transform_3, window_bounds = array<i64: 12, 128>}]} {
    %c0 = arith.constant 0 : index
    %c0_0 = arith.constant 0 : index
    %0 = vector.load %arg2[%c0, %c0_0] : memref<12x128xf32, #tpu.memory_space<vmem>>, vector<12x128xf32>
    %c0_1 = arith.constant 0 : index
    %c0_2 = arith.constant 0 : index
    %1 = vector.load %arg3[%c0_1, %c0_2] : memref<12x1xf32, #tpu.memory_space<vmem>>, vector<12x1xf32>
    %2 = vector.broadcast %1 : vector<12x1xf32> to vector<12x128xf32>
    %3 = arith.mulf %0, %2 : vector<12x128xf32>
    %c0_3 = arith.constant 0 : index
    %c0_4 = arith.constant 0 : index
    %4 = vector.load %arg4[%c0_3, %c0_4] : memref<12x1xf32, #tpu.memory_space<vmem>>, vector<12x1xf32>
    %5 = vector.broadcast %4 : vector<12x1xf32> to vector<12x128xf32>
    %6 = arith.addf %3, %5 : vector<12x128xf32>
    %c0_5 = arith.constant 0 : index
    %c0_6 = arith.constant 0 : index
    %7 = vector.load %arg5[%c0_5, %c0_6] : memref<12x128xf32, #tpu.memory_space<vmem>>, vector<12x128xf32>
    tpu.vector_store %arg5[%c0_5, %c0_6], %6 {strides = array<i32>} : memref<12x128xf32, #tpu.memory_space<vmem>>, vector<12x128xf32>,
    return
  }
  func.func @transform_0(%arg0: i32, %arg1: i32) -> (i32, i32) {
    %c0_i32 = arith.constant 0 : i32
    return %arg0, %arg1 : i32, i32
  }
  func.func @transform_1(%arg0: i32, %arg1: i32) -> (i32, i32) {
    %c0_i32 = arith.constant 0 : i32
    %c0_i32_0 = arith.constant 0 : i32
    return %arg0, %c0_i32 : i32, i32
  }
  func.func @transform_2(%arg0: i32, %arg1: i32) -> (i32, i32) {
    %c0_i32 = arith.constant 0 : i32
    %c0_i32_0 = arith.constant 0 : i32
    return %arg0, %c0_i32 : i32, i32
  }
  func.func @transform_3(%arg0: i32, %arg1: i32) -> (i32, i32) {
    %c0_i32 = arith.constant 0 : i32
    return %arg0, %arg1 : i32, i32
  }
}

</mosaic_0001>

<bundles_post_ra>
// kernel: tpu_custom_call.1
= control target key start
LH: loop header
LB: loop body
LE: loop exit
PB: predicated region body
PF: predicated region fallthrough
CT: control target
= control target key end

     0   :  { %v97_v2 = vmov 0   ;;  %s142_s0 = inlined_call_operand.vmem [shape: f32[12,128], index: 0, kind: input, shape index: {}]   ;;  %s143_s1 = inlined_call_operand.vmem [shape: f32[12,1], index: 1, kind: input, shape index: {}]   ;;  %s144_s2 = inlined_call_operand.vmem [shape: f32[12,1], index: 2, kind: input, shape index: {}]   ;;  %s145_s3 = inlined_call_operand.hbm [shape: f32[12,128], index: 3, kind: output, shape index: {}]  }
   0x1   :  { %v31_v0 = vld [vmem:[%s144_s2] sm:$0xff]  ;;  %70 = vset.pattern.permute.xlu1 %v97_v2  ;;  %69 = vset.pattern.permute.xlu0 %v97_v2 }
   0x2   :  { %v17_v1 = vld [vmem:[%s143_s1] sm:$0xff] }
   0x3   :  { %8 = vsyncpa [#allocation3], 0  ;;  %35 = vperm.xlu1 %70, %v31_v0   ;;  %21 = vperm.xlu0 %69, %v17_v1   ;;  %v32_v3 = vld [vmem:[%s144_s2 + $0x8] sm:$0xf]  ;;  %v15_v5 = vld [vmem:[%s142_s0] sm:$0xff]  ;;  %s98_s2 = smov [#allocation2]  }
   0x4   :  { %v18_v4 = vld [vmem:[%s143_s1 + $0x8] sm:$0xf]  ;;  %s51_s24 = sshll.u32 %s98_s2, 4  ;;  %s53_s1 = sshll.u32 %s145_s3, 4  ;;  %s52_s24 = int_to_ptr.vmem [resolvable:$true] %s51_s24  ;;  %s54_s1 = int_to_ptr.hbm [resolvable:$true] %s53_s1 }
   0x5   :  { %v16_v10 = vld [vmem:[%s142_s0 + $0x8] sm:$0xf]  ;;  %s99_s27 = smov 128   ;;  %s100_s28 = smov 8  }
   0xb   :  { %40 = vperm.xlu1 %70, %v32_v3   ;;  %26 = vperm.xlu0 %69, %v18_v4  }
  0x75   :  { %v36_v6 = vpop.permute.xlu1 %35  ;;  %v22_v7 = vpop.permute.xlu0 %21 }
  0x76   :  { %v29_v8 = vmul.f32 %v22_v7, %v15_v5 }
  0x78   :  { %v43_v9 = vadd.f32 %v36_v6, %v29_v8 }
  0x7a   :  { %45 = vst [vmem:[#allocation2] sm:$0xff] %v43_v9 }
  0x7d   :  { %v27_v11 = vpop.permute.xlu0 %26  ;;  %v41_v13 = vpop.permute.xlu1 %40 }
  0x7e   :  { %v30_v12 = vmul.f32 %v27_v11, %v16_v10 }
  0x80   :  { %v44_v14 = vadd.f32 %v41_v13, %v30_v12 }
  0x82   :  { %46 = vst [vmem:[#allocation2 + $0x8] sm:$0xf] %v44_v14 }
  0x83   :  { %59 = dma.vmem_to_hbm [thread:$0]  %s52_s24, 256, %s54_s1, [#allocation3], %s99_s27, %s99_s27, %s100_s28  }
  0x84   :  { %95 = dma.done.wait [#allocation3], 256  }
  0x85   :  { %96 = vsyncadd [#allocation3], 4294967040 }
  0x86   :  { %64 = vsyncpa [#allocation3], 1 }

</bundles_post_ra>
